<compile_context>
chip_gen: v7x
topology: tpu7x:2x2x1
jax: 0.10.0
libtpu: 0.0.40
codegen_flags: <defaults>
</compile_context>

<pallas_src>
import jax
import jax.numpy as jnp
from jax.experimental import pallas as pl
from jax.experimental.pallas import tpu as pltpu


# --------------------------------------------------------------------------
# Kernel: pure streaming copy of one (rows_per_block, lane) tile.
# --------------------------------------------------------------------------
def _copy2d_kernel(x_ref, o_ref):
    o_ref[...] = x_ref[...]


def _divisors(n: int):
    ds = set()
    i = 1
    while i * i <= n:
        if n % i == 0:
            ds.add(i)
            ds.add(n // i)
        i += 1
    return sorted(ds)


def _choose_2d_tiling(total: int, itemsize: int):
    """Pick a lane-dense 2-D factorization (rows, lane) and a row-block size."""
    # Lane dim: largest multiple of 128 dividing `total`, capped at 2048
    # (2048 lanes keeps rows factorable and stores fully unmasked).
    lane = 128
    while total % (lane * 2) == 0 and lane * 2 <= 2048:
        lane *= 2
    rows = total // lane

    # Row block: largest divisor of `rows` with block bytes <= ~4 MiB and
    # satisfying the (8, 128) tiling rule (multiple of 8, or the full dim).
    target_block_bytes = 4 * 1024 * 1024
    max_rows = max(1, target_block_bytes // (lane * itemsize))
    rows_per_block = rows  # safe default: whole array as one block
    for cand in _divisors(rows):
        if cand <= max_rows and (cand % 8 == 0 or cand == rows):
            rows_per_block = cand  # divisors are sorted ascending -> keep max
    return lane, rows, rows_per_block


# --------------------------------------------------------------------------
# Wrapper: (N, C, D, H, W) -> (N, C*D, H, W)
# --------------------------------------------------------------------------
def height_compression(spatial_features_5d: jax.Array) -> jax.Array:
    N, C, D, H, W = spatial_features_5d.shape
    out_shape = (N, C * D, H, W)
    total = N * C * D * H * W
    dtype = spatial_features_5d.dtype
    itemsize = jnp.dtype(dtype).itemsize

    if total % 128 != 0:
        # Degenerate shapes: the op is semantically a free view anyway.
        return jnp.reshape(spatial_features_5d, out_shape)

    lane, rows, rows_per_block = _choose_2d_tiling(total, itemsize)

    # Metadata-only reshape to a lane-dense 2-D slab (same contiguous layout
    # as the NCDHW input and the (N, C*D, H, W) output, so a straight copy of
    # this slab reproduces torch's .view exactly).
    x2d = jnp.reshape(spatial_features_5d, (rows, lane))

    spec = pl.BlockSpec((rows_per_block, lane), lambda i: (i, 0))

    out2d = pl.pallas_call(
        _copy2d_kernel,
        out_shape=jax.ShapeDtypeStruct((rows, lane), dtype),
        grid_spec=pltpu.PrefetchScalarGridSpec(
            num_scalar_prefetch=0,
            grid=(rows // rows_per_block,),
            in_specs=[spec],
            out_specs=spec,
        ),
        compiler_params=pltpu.CompilerParams(
            dimension_semantics=("parallel",),
            vmem_limit_bytes=32 * 1024 * 1024,
        ),
    )(x2d)

    return jnp.reshape(out2d, out_shape)


def height_compression_forward(batch_dict: dict) -> dict:
    """Mirrors HeightCompression.forward on an already-densified tensor."""
    spatial_features_5d = batch_dict["encoded_spconv_tensor"]  # (N, C, D, H, W)
    batch_dict["spatial_features"] = height_compression(spatial_features_5d)
    batch_dict["spatial_features_stride"] = batch_dict[
        "encoded_spconv_tensor_stride"
    ]
    return batch_dict


if __name__ == "__main__":
    # Small shapes consistent with the module: N=2, C=4, D=2, H=16, W=16
    # -> NUM_BEV_FEATURES = C*D = 8
    N, C, D, H, W = 2, 4, 2, 16, 16
    key = jax.random.PRNGKey(0)
    k1, k2 = jax.random.split(key)

    # Simulate encoded_spconv_tensor.dense(): mostly zeros, random features.
    dense = jax.random.normal(k1, (N, C, D, H, W), dtype=jnp.float32)
    mask = (jax.random.uniform(k2, (N, 1, D, H, W)) < 0.2).astype(jnp.float32)
    dense = dense * mask

    batch_dict = {
        "encoded_spconv_tensor": dense,
        "encoded_spconv_tensor_stride": 8,
    }

    out_dict = height_compression_forward(batch_dict)
    spatial_features = jax.block_until_ready(out_dict["spatial_features"])

    # Reference: exact torch .view semantics on a contiguous NCDHW tensor.
    ref = jnp.reshape(dense, (N, C * D, H, W))
    assert spatial_features.shape == (N, C * D, H, W)
    assert spatial_features.dtype == dense.dtype
    assert out_dict["spatial_features_stride"] == 8
    assert jnp.array_equal(spatial_features, ref)

    print("KERNEL_OK")
</pallas_src>

<mosaic_0001>
module attributes {stable_mosaic.version = 11 : i64} {
  func.func @_copy2d_kernel(%arg0: i32, %arg1: memref<2x2048xf32, #tpu.memory_space<vmem>>, %arg2: memref<2x2048xf32, #tpu.memory_space<vmem>>) attributes {dimension_semantics = [#tpu.dimension_semantics<parallel>], iteration_bounds = array<i64: 1>, scalar_prefetch = 0 : i64, scratch_operands = 0 : i64, tpu.core_type = #tpu.core_type<tc>, window_params = [{transform_indices = @transform_0, window_bounds = array<i64: 2, 2048>}, {transform_indices = @transform_1, window_bounds = array<i64: 2, 2048>}]} {
    %c0 = arith.constant 0 : index
    %c0_0 = arith.constant 0 : index
    %0 = vector.load %arg1[%c0, %c0_0] : memref<2x2048xf32, #tpu.memory_space<vmem>>, vector<2x2048xf32>
    %c0_1 = arith.constant 0 : index
    %c0_2 = arith.constant 0 : index
    %1 = vector.load %arg2[%c0_1, %c0_2] : memref<2x2048xf32, #tpu.memory_space<vmem>>, vector<2x2048xf32>
    tpu.vector_store %arg2[%c0_1, %c0_2], %0 {strides = array<i32>} : memref<2x2048xf32, #tpu.memory_space<vmem>>, vector<2x2048xf32>,
    return
  }
  func.func @transform_0(%arg0: i32) -> (i32, i32) {
    %c0_i32 = arith.constant 0 : i32
    %c0_i32_0 = arith.constant 0 : i32
    return %arg0, %c0_i32 : i32, i32
  }
  func.func @transform_1(%arg0: i32) -> (i32, i32) {
    %c0_i32 = arith.constant 0 : i32
    %c0_i32_0 = arith.constant 0 : i32
    return %arg0, %c0_i32 : i32, i32
  }
}

</mosaic_0001>

<bundles_post_ra>
// kernel: tpu_custom_call.1
= control target key start
LH: loop header
LB: loop body
LE: loop exit
PB: predicated region body
PF: predicated region fallthrough
CT: control target
= control target key end

     0   :  { %6 = vsyncpa [#allocation3], 0  ;;  %s130_s0 = inlined_call_operand.hbm [shape: f32[2,2048], index: 0, kind: input, shape index: {}]   ;;  %s131_s1 = inlined_call_operand.hbm [shape: f32[2,2048], index: 1, kind: output, shape index: {}]  }
   0x1   :  { %7 = vsyncpa [#allocation4], 0  ;;  %s94_s6 = smov [#allocation2]   ;;  %s46_s10 = scalar_lea.hbm %s130_s0, 512 }
   0x2   :  { %s14_s7 = sshll.u32 %s94_s6, 4  ;;  %p47_p0 = scmp.ne.s32.totalorder %s130_s0, %s46_s10  ;;  %s15_s7 = int_to_ptr.vmem [resolvable:$true] %s14_s7 }
   0x3   :  { %p50_p1 = scmp.lt.u32.totalorder %s46_s10, %s130_s0 }
   0x5   :  { %p52_p2 = pnand %p50_p1, %p47_p0 }
   0x7   :  { %55 = shalt.err (!%p52_p2)
}
   0x8   :  { %s56_s15 = scalar_lea.vmem %s15_s7, 512  ;;  %p61_p4 = scmp.lt.s32.totalorder %s15_s7, %s15_s7 }
   0x9   :  { %p57_p3 = scmp.ne.s32.totalorder %s15_s7, %s56_s15  ;;  %p62_p5 = scmp.lt.s32.totalorder %s56_s15, %s56_s15 }
   0xb   :  { %p63_p6 = por %p62_p5, %p61_p4 }
   0xd   :  { %p64_p7 = pnand %p63_p6, %p57_p3 }
   0xf   :  { %67 = shalt.err (!%p64_p7)
}
  0x10   :  { %17 = dma.hbm_to_vmem [thread:$0]  %s130_s0, 512, %s15_s7, [#allocation3]  }
  0x11   :  { %90 = dma.done.wait [#allocation3], 512  }
  0x12   :  { %91 = vsyncadd [#allocation3], 4294966784  ;;  %s95_s18 = smov [#allocation5]   ;;  %v21_v0 = vld [vmem:[#allocation2] sm:$0xff]  ;;  %v22_v1 = vld [vmem:[#allocation2 + $0x8] sm:$0xff] }
  0x13   :  { %s35_s19 = sshll.u32 %s95_s18, 4  ;;  %v23_v2 = vld [vmem:[#allocation2 + $0x10] sm:$0xff]  ;;  %25 = vst [vmem:[#allocation5] sm:$0xff] %v21_v0  ;;  %26 = vst [vmem:[#allocation5 + $0x8] sm:$0xff] %v22_v1  ;;  %v24_v3 = vld [vmem:[#allocation2 + $0x18] sm:$0xff]  ;;  %s36_s19 = int_to_ptr.vmem [resolvable:$true] %s35_s19 }
  0x14   :  { %27 = vst [vmem:[#allocation5 + $0x10] sm:$0xff] %v23_v2  ;;  %28 = vst [vmem:[#allocation5 + $0x18] sm:$0xff] %v24_v3  ;;  %s68_s20 = scalar_lea.vmem %s36_s19, 512  ;;  %p73_p9 = scmp.lt.s32.totalorder %s36_s19, %s36_s19 }
  0x15   :  { %p69_p8 = scmp.ne.s32.totalorder %s36_s19, %s68_s20  ;;  %p74_p10 = scmp.lt.s32.totalorder %s68_s20, %s68_s20 }
  0x17   :  { %p75_p11 = por %p74_p10, %p73_p9 }
  0x19   :  { %p76_p12 = pnand %p75_p11, %p69_p8 }
  0x1b   :  { %79 = shalt.err (!%p76_p12)
}
  0x1c   :  { %s80_s22 = scalar_lea.hbm %s131_s1, 512 }
  0x1d   :  { %p81_p13 = scmp.ne.s32.totalorder %s131_s1, %s80_s22  ;;  %p84_p0 = scmp.lt.u32.totalorder %s80_s22, %s131_s1 }
  0x1f   :  { %p86_p1 = pnand %p84_p0, %p81_p13 }
  0x21   :  { %89 = shalt.err (!%p86_p1)
}
  0x22   :  { %38 = dma.vmem_to_hbm [thread:$0]  %s36_s19, 512, %s131_s1, [#allocation4]  }
  0x23   :  { %92 = dma.done.wait [#allocation4], 512  }
  0x24   :  { %93 = vsyncadd [#allocation4], 4294966784 }
  0x25   :  { %42 = vsyncpa [#allocation3], 1 }
  0x26   :  { %43 = vsyncpa [#allocation4], 1 }

</bundles_post_ra>
